<compile_context>
chip_gen: v6e
topology: v6e:2x2x1
jax: 0.10.0
libtpu: 0.0.40
codegen_flags: <defaults>
</compile_context>

<pallas_src>
import jax
import jax.numpy as jnp
from jax.experimental import pallas as pl
from jax.experimental.pallas import tpu as pltpu


IN_DIM = 28 * 28   # 784
HID = 64
OUT = 10
HID_PAD = 128      # lane-dense hidden width inside the kernel
OUT_PAD = 128      # lane-dense output width inside the kernel
MAX_TB = 512       # batch tile (sized for v7x's 64 MiB VMEM w/ double-buffering)


def _round_up(n, m):
    return ((n + m - 1) // m) * m


def _kl_term(mu, rho):
    # KL( N(mu, sigma^2) || N(0, 1) ), summed over all weight elements.
    sigma = jnp.log1p(jnp.exp(rho))            # softplus
    return jnp.sum(-jnp.log(sigma) + 0.5 * (sigma * sigma + mu * mu) - 0.5)


def fcnet_kernel(x_ref, w1_ref, w2_ref, out_ref):
    # Fused 2-layer MLP on the MXU, f32 accumulation, bf16 operands.
    x = x_ref[...]                                                     # [TB, 784] bf16
    h = jnp.dot(x, w1_ref[...], preferred_element_type=jnp.float32)    # [TB, 128] f32
    h = jnp.maximum(h, 0.0)                                            # ReLU (layer-1 activation)
    logits = jnp.dot(h.astype(jnp.bfloat16), w2_ref[...],
                     preferred_element_type=jnp.float32)               # [TB, 128] f32
    # Sigmoid via tanh: single EUP transcendental, no exp overflow / divide.
    out_ref[...] = (0.5 * jnp.tanh(0.5 * logits) + 0.5).astype(out_ref.dtype)


def init_params(key):
    k1, k2 = jax.random.split(key, 2)
    # Posterior params stored directly in [in, out] layout (no transposes later).
    mu1 = 0.05 * jax.random.normal(k1, (IN_DIM, HID), dtype=jnp.float32)
    rho1 = jnp.full((IN_DIM, HID), -5.0, dtype=jnp.float32)
    mu2 = 0.05 * jax.random.normal(k2, (HID, OUT), dtype=jnp.float32)
    rho2 = jnp.full((HID, OUT), -5.0, dtype=jnp.float32)
    return mu1, rho1, mu2, rho2


def sample_weights(params, key):
    mu1, rho1, mu2, rho2 = params
    e1, e2 = jax.random.split(key, 2)
    eps1 = jax.random.normal(e1, mu1.shape, dtype=jnp.float32)
    eps2 = jax.random.normal(e2, mu2.shape, dtype=jnp.float32)
    w1 = mu1 + jnp.log1p(jnp.exp(rho1)) * eps1   # [784, 64]
    w2 = mu2 + jnp.log1p(jnp.exp(rho2)) * eps2   # [64, 10]
    return w1, w2


def fcnet_forward(x_img, params, sample_key):
    mu1, rho1, mu2, rho2 = params

    # KL computed in the wrapper: fuses with sampling, keeps mu/rho out of the
    # kernel's HBM traffic, and is batch-independent anyway.
    kl = _kl_term(mu1, rho1) + _kl_term(mu2, rho2)

    w1, w2 = sample_weights(params, sample_key)          # [784,64], [64,10]

    x = x_img.reshape(-1, IN_DIM).astype(jnp.float32)    # [B, 784]
    B = x.shape[0]

    # Batch tiling: TB divisible by 8; pad batch up to a multiple of TB.
    TB = min(MAX_TB, _round_up(B, 8))
    B_pad = _round_up(B, TB)

    x_p = jnp.pad(x, ((0, B_pad - B), (0, 0))).astype(jnp.bfloat16)          # [B_pad, 784]
    w1_p = jnp.pad(w1, ((0, 0), (0, HID_PAD - HID))).astype(jnp.bfloat16)    # [784, 128]
    w2_p = jnp.pad(w2, ((0, HID_PAD - HID), (0, OUT_PAD - OUT))).astype(jnp.bfloat16)  # [128, 128]

    out_p = pl.pallas_call(
        fcnet_kernel,
        grid=(B_pad // TB,),
        in_specs=[
            pl.BlockSpec((TB, IN_DIM), lambda i: (i, 0)),        # x: streamed per tile
            pl.BlockSpec((IN_DIM, HID_PAD), lambda i: (0, 0)),   # W1: resident
            pl.BlockSpec((HID_PAD, OUT_PAD), lambda i: (0, 0)),  # W2: resident
        ],
        out_specs=pl.BlockSpec((TB, OUT_PAD), lambda i: (i, 0)),
        out_shape=jax.ShapeDtypeStruct((B_pad, OUT_PAD), jnp.float32),
        compiler_params=pltpu.CompilerParams(
            dimension_semantics=("parallel",)),
    )(x_p, w1_p, w2_p)

    return out_p[:B, :OUT], kl


def fcnet_forward_ref(x_img, params, sample_key):
    # Pure-JAX f32 reference for sanity checking.
    mu1, rho1, mu2, rho2 = params
    w1, w2 = sample_weights(params, sample_key)
    x = x_img.reshape(-1, IN_DIM).astype(jnp.float32)
    h = jnp.maximum(x @ w1, 0.0)
    out = jax.nn.sigmoid(h @ w2)
    kl = _kl_term(mu1, rho1) + _kl_term(mu2, rho2)
    return out, kl


if __name__ == "__main__":
    key = jax.random.PRNGKey(0)
    k_param, k_sample, k_x = jax.random.split(key, 3)

    params = init_params(k_param)
    # Small MNIST-like input, NCHW: [batch=2, channels=1, 28, 28].
    x = jax.random.normal(k_x, (2, 1, 28, 28), dtype=jnp.float32)

    out, kl = fcnet_forward(x, params, k_sample)
    out = jax.block_until_ready(out)
    kl = jax.block_until_ready(kl)

    out_ref, kl_ref = fcnet_forward_ref(x, params, k_sample)
    assert out.shape == (2, OUT)
    # bf16 operands w/ f32 accumulation vs pure-f32 reference: loose-ish atol.
    assert jnp.allclose(out, out_ref, atol=2e-2, rtol=1e-2)
    assert jnp.allclose(kl, kl_ref, atol=1e-5, rtol=1e-5)

    print("KERNEL_OK")
</pallas_src>

<mosaic_0001>
module attributes {stable_mosaic.version = 11 : i64} {
  func.func @fcnet_kernel(%arg0: i32, %arg1: memref<8x784xbf16, #tpu.memory_space<vmem>>, %arg2: memref<784x128xbf16, #tpu.memory_space<vmem>>, %arg3: memref<128x128xbf16, #tpu.memory_space<vmem>>, %arg4: memref<8x128xf32, #tpu.memory_space<vmem>>) attributes {dimension_semantics = [#tpu.dimension_semantics<parallel>], iteration_bounds = array<i64: 1>, scalar_prefetch = 0 : i64, scratch_operands = 0 : i64, tpu.core_type = #tpu.core_type<tc>, window_params = [{transform_indices = @transform_0, window_bounds = array<i64: 8, 784>}, {pipeline_mode = #tpu.pipeline_mode<synchronous>, transform_indices = @transform_1, window_bounds = array<i64: 784, 128>}, {pipeline_mode = #tpu.pipeline_mode<synchronous>, transform_indices = @transform_2, window_bounds = array<i64: 128, 128>}, {transform_indices = @transform_3, window_bounds = array<i64: 8, 128>}]} {
    %c0 = arith.constant 0 : index
    %c0_0 = arith.constant 0 : index
    %0 = vector.load %arg1[%c0, %c0_0] : memref<8x784xbf16, #tpu.memory_space<vmem>>, vector<8x784xbf16>
    %c0_1 = arith.constant 0 : index
    %c0_2 = arith.constant 0 : index
    %1 = vector.load %arg2[%c0_1, %c0_2] : memref<784x128xbf16, #tpu.memory_space<vmem>>, vector<784x128xbf16>
    %cst = arith.constant dense<0.000000e+00> : vector<8x128xf32>
    %2 = tpu.matmul %0, %1, %cst {dimension_numbers = #tpu.dot_dimension_numbers<[1], [0], [0], [1], [0, 0, 1, 1], [], []>} : vector<8x784xbf16>, vector<784x128xbf16>, vector<8x128xf32> -> vector<8x128xf32>
    %cst_3 = arith.constant 0.000000e+00 : f32
    %3 = vector.broadcast %cst_3 : f32 to vector<8x128xf32>
    %4 = arith.maximumf %2, %3 : vector<8x128xf32>
    %5 = arith.truncf %4 : vector<8x128xf32> to vector<8x128xbf16>
    %c0_4 = arith.constant 0 : index
    %c0_5 = arith.constant 0 : index
    %6 = vector.load %arg3[%c0_4, %c0_5] : memref<128x128xbf16, #tpu.memory_space<vmem>>, vector<128x128xbf16>
    %cst_6 = arith.constant dense<0.000000e+00> : vector<8x128xf32>
    %7 = tpu.matmul %5, %6, %cst_6 {dimension_numbers = #tpu.dot_dimension_numbers<[1], [0], [0], [1], [0, 0, 1, 1], [], []>} : vector<8x128xbf16>, vector<128x128xbf16>, vector<8x128xf32> -> vector<8x128xf32>
    %cst_7 = arith.constant 5.000000e-01 : f32
    %8 = vector.broadcast %cst_7 : f32 to vector<8x128xf32>
    %9 = arith.mulf %8, %7 : vector<8x128xf32>
    %10 = math.tanh %9 : vector<8x128xf32>
    %cst_8 = arith.constant 5.000000e-01 : f32
    %11 = vector.broadcast %cst_8 : f32 to vector<8x128xf32>
    %12 = arith.mulf %11, %10 : vector<8x128xf32>
    %cst_9 = arith.constant 5.000000e-01 : f32
    %13 = vector.broadcast %cst_9 : f32 to vector<8x128xf32>
    %14 = arith.addf %12, %13 : vector<8x128xf32>
    %c0_10 = arith.constant 0 : index
    %c0_11 = arith.constant 0 : index
    %15 = vector.load %arg4[%c0_10, %c0_11] : memref<8x128xf32, #tpu.memory_space<vmem>>, vector<8x128xf32>
    tpu.vector_store %arg4[%c0_10, %c0_11], %14 {strides = array<i32>} : memref<8x128xf32, #tpu.memory_space<vmem>>, vector<8x128xf32>,
    return
  }
  func.func @transform_0(%arg0: i32) -> (i32, i32) {
    %c0_i32 = arith.constant 0 : i32
    %c0_i32_0 = arith.constant 0 : i32
    return %arg0, %c0_i32 : i32, i32
  }
  func.func @transform_1(%arg0: i32) -> (i32, i32) {
    %c0_i32 = arith.constant 0 : i32
    %c0_i32_0 = arith.constant 0 : i32
    %c0_i32_1 = arith.constant 0 : i32
    return %c0_i32, %c0_i32_0 : i32, i32
  }
  func.func @transform_2(%arg0: i32) -> (i32, i32) {
    %c0_i32 = arith.constant 0 : i32
    %c0_i32_0 = arith.constant 0 : i32
    %c0_i32_1 = arith.constant 0 : i32
    return %c0_i32, %c0_i32_0 : i32, i32
  }
  func.func @transform_3(%arg0: i32) -> (i32, i32) {
    %c0_i32 = arith.constant 0 : i32
    %c0_i32_0 = arith.constant 0 : i32
    return %arg0, %c0_i32 : i32, i32
  }
}

</mosaic_0001>

<bundles_post_ra>
// kernel: tpu_custom_call.1
= control target key start
LH: loop header
LB: loop body
LE: loop exit
PB: predicated region body
PF: predicated region fallthrough
CT: control target
= control target key end

     0   :  { %8 = vsyncpa [#allocation3], 0  ;;  %s1147_s0 = inlined_call_operand.hbm [shape: bf16[8,784], index: 0, kind: input, shape index: {}]   ;;  %s1148_s1 = inlined_call_operand.hbm [shape: bf16[784,128], index: 1, kind: input, shape index: {}]   ;;  %s1149_s2 = inlined_call_operand.hbm [shape: bf16[128,128], index: 2, kind: input, shape index: {}]   ;;  %s1150_s3 = inlined_call_operand.hbm [shape: f32[8,128], index: 3, kind: output, shape index: {}]  }
   0x1   :  { %9 = vsyncpa [#allocation6], 0 }
   0x2   :  { %10 = vsyncpa [#allocation4], 0  ;;  %s1094_s12 = smov [#allocation5]  }
   0x3   :  { %s26_s13 = sshll.u32 %s1094_s12, 4  ;;  %s27_s13 = int_to_ptr.vmem [resolvable:$true] %s26_s13 }
   0x4   :  { %s1016_s14 = scalar_lea.vmem %s27_s13, 6272  ;;  %p1021_p1 = scmp.lt.s32.totalorder %s27_s13, %s27_s13 }
   0x5   :  { %p1017_p0 = scmp.ne.s32.totalorder %s27_s13, %s1016_s14  ;;  %p1022_p2 = scmp.lt.s32.totalorder %s1016_s14, %s1016_s14 }
   0x7   :  { %p1023_p3 = por %p1022_p2, %p1021_p1 }
   0x9   :  { %p1024_p4 = pnand %p1023_p3, %p1017_p0 }
   0xb   :  { %1027 = shalt.err (!%p1024_p4)
}
   0xc   :  { %s1095_s15 = smov 64   ;;  %s1096_s16 = smov 4  }
   0xd   :  { %32 = dma.hbm_to_vmem [thread:$0]  %s1148_s1, 6272, %s27_s13, [#allocation6], %s1095_s15, %s1095_s15, %s1096_s16  }
   0xe   :  { %s1097_s19 = smov [#allocation2]   ;;  %s1098_s21 = smov [#allocation7]  }
   0xf   :  { %s17_s20 = sshll.u32 %s1097_s19, 4  ;;  %s38_s22 = sshll.u32 %s1098_s21, 4  ;;  %s18_s20 = int_to_ptr.vmem [resolvable:$true] %s17_s20  ;;  %s39_s22 = int_to_ptr.vmem [resolvable:$true] %s38_s22 }
  0x10   :  { %s1036_s23 = scalar_lea.vmem %s18_s20, 448  ;;  %p1041_p6 = scmp.lt.s32.totalorder %s18_s20, %s18_s20 }
  0x11   :  { %p1037_p5 = scmp.ne.s32.totalorder %s18_s20, %s1036_s23  ;;  %p1042_p7 = scmp.lt.s32.totalorder %s1036_s23, %s1036_s23 }
  0x13   :  { %p1043_p8 = por %p1042_p7, %p1041_p6 }
  0x15   :  { %p1044_p9 = pnand %p1043_p8, %p1037_p5 }
  0x17   :  { %1047 = shalt.err (!%p1044_p9)
}
  0x18   :  { %20 = dma.hbm_to_vmem [thread:$0]  %s1147_s0, 448, %s18_s20, [#allocation3]  }
  0x19   :  { %s1056_s26 = scalar_lea.vmem %s39_s22, 1024  ;;  %p1061_p11 = scmp.lt.s32.totalorder %s39_s22, %s39_s22 }
  0x1a   :  { %p1057_p10 = scmp.ne.s32.totalorder %s39_s22, %s1056_s26  ;;  %p1062_p12 = scmp.lt.s32.totalorder %s1056_s26, %s1056_s26 }
  0x1c   :  { %p1063_p13 = por %p1062_p12, %p1061_p11 }
  0x1e   :  { %p1064_p0 = pnand %p1063_p13, %p1057_p10 }
  0x20   :  { %1067 = shalt.err (!%p1064_p0)
}
  0x21   :  { %44 = dma.hbm_to_vmem [thread:$0]  %s1149_s2, 1024, %s39_s22, [#allocation6], %s1095_s15, %s1095_s15, %s1096_s16  }
  0x22   :  { %1088 = dma.done.wait [#allocation3], 448  }
  0x23   :  { %1089 = vsyncadd [#allocation3], 4294966848 }
  0x24   :  { %1090 = dma.done.wait [#allocation6], 7296  }
  0x25   :  { %1091 = vsyncadd [#allocation6], 4294960000  ;;  %v942_v0 = vld [vmem:[#allocation5 + $0x78] sm:$0xff]   ;;  %v946_v4 = vld [vmem:[#allocation5 + $0x70] sm:$0xff]   ;;  %v1099_v40 = vmov 0.0   ;;  %vm1100_vm0 = vmmov 0  }
  0x26   :  { %v943_v1 = vld [vmem:[#allocation5 + $0xf8] sm:$0xff]   ;;  %831 = vmatprep.subr.bf16.mxu0 %v942_v0  ;;  %v947_v5 = vld [vmem:[#allocation5 + $0xf0] sm:$0xff]   ;;  %v950_v8 = vld [vmem:[#allocation5 + $0x68] sm:$0xff]   ;;  %vm475_vm1 = vcmask 130048   ;;  %s1101_s0 = smov [#allocation8]  }
  0x27   :  { %v944_v2 = vld [vmem:[#allocation5 + $0x38] sm:$0xff]   ;;  %853 = vmatprep.subr.bf16.mxu1 %v943_v1  ;;  %v948_v6 = vld [vmem:[#allocation5 + $0x30] sm:$0xff]   ;;  %v951_v9 = vld [vmem:[#allocation5 + $0xe8] sm:$0xff]   ;;  %s756_s2 = sshll.u32 %s1101_s0, 4  ;;  %s757_s2 = int_to_ptr.vmem [resolvable:$true] %s756_s2 }
  0x28   :  { %v945_v3 = vld [vmem:[#allocation5 + $0xb8] sm:$0xff]   ;;  %832 = vmatpush3.bf16.msra.mxu0 %v944_v2  ;;  %v949_v7 = vld [vmem:[#allocation5 + $0xb0] sm:$0xff]   ;;  %v952_v10 = vld [vmem:[#allocation5 + $0x28] sm:$0xff]   ;;  %s1068_s28 = scalar_lea.vmem %s757_s2, 128  ;;  %p1073_p2 = scmp.lt.s32.totalorder %s757_s2, %s757_s2 }
  0x29   :  { %854 = vmatpush3.bf16.msra.mxu1 %v945_v3  ;;  %833 = vmatprep.subr.bf16.mxu0 %v946_v4  ;;  %v953_v11 = vld [vmem:[#allocation5 + $0xa8] sm:$0xff]   ;;  %v954_v12 = vld [vmem:[#allocation5 + $0x60] sm:$0xff]   ;;  %v958_v16 = vld [vmem:[#allocation5 + $0x58] sm:$0xff]   ;;  %p1069_p1 = scmp.ne.s32.totalorder %s757_s2, %s1068_s28  ;;  %p1074_p3 = scmp.lt.s32.totalorder %s1068_s28, %s1068_s28 }
  0x2a   :  { %855 = vmatprep.subr.bf16.mxu1 %v947_v5  ;;  %v955_v13 = vld [vmem:[#allocation5 + $0xe0] sm:$0xff]   ;;  %v959_v17 = vld [vmem:[#allocation5 + $0xd8] sm:$0xff]   ;;  %v962_v20 = vld [vmem:[#allocation5 + $0x50] sm:$0xff]  }
  0x2b   :  { %v956_v14 = vld [vmem:[#allocation5 + $0x20] sm:$0xff]   ;;  %v960_v18 = vld [vmem:[#allocation5 + $0x18] sm:$0xff]   ;;  %v963_v21 = vld [vmem:[#allocation5 + $0xd0] sm:$0xff]   ;;  %p1075_p4 = por %p1074_p3, %p1073_p2 }
  0x2c   :  { %834 = vmatpush3.bf16.msra.mxu0 %v948_v6  ;;  %v957_v15 = vld [vmem:[#allocation5 + $0xa0] sm:$0xff]   ;;  %v961_v19 = vld [vmem:[#allocation5 + $0x98] sm:$0xff]   ;;  %v964_v22 = vld [vmem:[#allocation5 + $0x10] sm:$0xff]  }
  0x2d   :  { %856 = vmatpush3.bf16.msra.mxu1 %v949_v7  ;;  %835 = vmatprep.subr.bf16.mxu0 %v950_v8  ;;  %v965_v23 = vld [vmem:[#allocation5 + $0x90] sm:$0xff]   ;;  %v966_v24 = vld [vmem:[#allocation5 + $0x48] sm:$0xff]   ;;  %v970_v28 = vld [vmem:[#allocation5 + $0x40] sm:$0xff]   ;;  %p1076_p5 = pnand %p1075_p4, %p1069_p1 }
  0x2e   :  { %857 = vmatprep.subr.bf16.mxu1 %v951_v9  ;;  %v967_v25 = vld [vmem:[#allocation5 + $0xc8] sm:$0xff]   ;;  %v971_v29 = vld [vmem:[#allocation5 + $0xc0] sm:$0xff]   ;;  %v978_v38 = vld [vmem:[#allocation5 + $0x178] sm:$0xff]  }
  0x2f   :  { %v968_v26 = vld [vmem:[#allocation5 + $0x8] sm:$0xff]   ;;  %v972_v30 = vld [vmem:[#allocation5] sm:$0xff]   ;;  %v979_v39 = vld [vmem:[#allocation5 + $0x138] sm:$0xff]  }
  0x30   :  { %836 = vmatpush3.bf16.msra.mxu0 %v952_v10  ;;  %v969_v27 = vld [vmem:[#allocation5 + $0x88] sm:$0xff]   ;;  %v973_v31 = vld [vmem:[#allocation5 + $0x80] sm:$0xff]   ;;  %v980_v41 = vld [vmem:[#allocation5 + $0x170] sm:$0xff]  }
  0x31   :  { %858 = vmatpush3.bf16.msra.mxu1 %v953_v11  ;;  %837 = vmatprep.subr.bf16.mxu0 %v954_v12  ;;  %v55_v32 = vld [vmem:[#allocation2] sm:$0xff]  ;;  %v56_v33 = vld [vmem:[#allocation2 + $0x8] sm:$0xff]  ;;  %v986_v47 = vld [vmem:[#allocation5 + $0x158] sm:$0xff]  }
  0x32   :  { %859 = vmatprep.subr.bf16.mxu1 %v955_v13  ;;  %v766_v34 = vcombine.low %v55_v32, %v55_v32  ;;  %v767_v35 = vcombine.high %v55_v32, %v55_v32  ;;  %v768_v36 = vcombine.low %v56_v33, %v56_v33  ;;  %v769_v37 = vcombine.high %v56_v33, %v56_v33  ;;  %v981_v42 = vld [vmem:[#allocation5 + $0x130] sm:$0xff]   ;;  %v982_v43 = vld [vmem:[#allocation5 + $0x168] sm:$0xff]   ;;  %v984_v45 = vld [vmem:[#allocation5 + $0x160] sm:$0xff]  }
  0x33   :  { %v983_v44 = vld [vmem:[#allocation5 + $0x128] sm:$0xff]   ;;  %v985_v46 = vld [vmem:[#allocation5 + $0x120] sm:$0xff]   ;;  %v987_v48 = vld [vmem:[#allocation5 + $0x118] sm:$0xff]  }
  0x34   :  { %838 = vmatpush3.bf16.msra.mxu0 %v956_v14  ;;  %511 = vmatprep.mubr.bf16.mxu0 %v767_v35  ;;  %v988_v49 = vld [vmem:[#allocation5 + $0x150] sm:$0xff]   ;;  %v994_v50 = vld [vmem:[#allocation5 + $0x180] sm:$0xff]   ;;  %v997_v53 = vld [vmem:[#allocation2 + $0x18] ss:$0 sps:$4 sm:$0xff]  }
  0x35   :  { %860 = vmatpush3.bf16.msra.mxu1 %v957_v15  ;;  %839 = vmatprep.subr.bf16.mxu0 %v958_v16  ;;  %v57_v51 = vld [vmem:[#allocation2 + $0x10] sm:$0xff]  ;;  %v990_v55 = vld [vmem:[#allocation5 + $0x148] sm:$0xff]   ;;  %v992_v57 = vld [vmem:[#allocation5 + $0x140] sm:$0xff]  }
  0x36   :  { %861 = vmatprep.subr.bf16.mxu1 %v959_v17  ;;  %551 = vmatprep.mubr.bf16.mxu1 %v769_v37  ;;  %v771_v52 = vcombine.high %v57_v51, %v57_v51  ;;  %v989_v54 = vld [vmem:[#allocation5 + $0x110] sm:$0xff]   ;;  %v991_v56 = vld [vmem:[#allocation5 + $0x108] sm:$0xff]   ;;  %v993_v58 = vld [vmem:[#allocation5 + $0x100] sm:$0xff]   ;;  %v770_v59 = vcombine.low %v57_v51, %v57_v51 }
  0x37   :  { %v998_v60 = vld [vmem:[#allocation7 + $0x38] sm:$0xff]   ;;  %v999_v61 = vld [vmem:[#allocation7 + $0x30] sm:$0xff]   ;;  %v1000_v62 = vld [vmem:[#allocation7 + $0x28] sm:$0xff]  }
  0x38   :  { %840 = vmatpush3.bf16.msra.mxu0 %v960_v18  ;;  %v1001_v63 = vld [vmem:[#allocation7 + $0x20] sm:$0xff]   ;;  %v1002_v0 = vld [vmem:[#allocation7 + $0x18] sm:$0xff]   ;;  %v1003_v1 = vld [vmem:[#allocation7 + $0x10] sm:$0xff]  }
  0x39   :  { %862 = vmatpush3.bf16.msra.mxu1 %v961_v19  ;;  %841 = vmatprep.subr.bf16.mxu0 %v962_v20  ;;  %v1004_v2 = vld [vmem:[#allocation7 + $0x8] sm:$0xff]   ;;  %v1005_v3 = vld [vmem:[#allocation7] sm:$0xff]  }
  0x3a   :  { %863 = vmatprep.subr.bf16.mxu1 %v963_v21 }
  0x3c   :  { %842 = vmatpush3.bf16.msra.mxu0 %v964_v22 }
  0x3d   :  { %864 = vmatpush3.bf16.msra.mxu1 %v965_v23  ;;  %843 = vmatprep.subr.bf16.mxu0 %v966_v24 }
  0x3e   :  { %865 = vmatprep.subr.bf16.mxu1 %v967_v25 }
  0x40   :  { %844 = vmatpush3.bf16.msra.mxu0 %v968_v26 }
  0x41   :  { %866 = vmatpush3.bf16.msra.mxu1 %v969_v27  ;;  %845 = vmatprep.subr.bf16.mxu0 %v970_v28 }
  0x42   :  { %867 = vmatprep.subr.bf16.mxu1 %v971_v29 }
  0x44   :  { %846 = vmatpush3.bf16.msra.mxu0 %v972_v30 }
  0x45   :  { %868 = vmatpush3.bf16.msra.mxu1 %v973_v31  ;;  %875 = vmatprep.subr.bf16.mxu0 %v978_v38 }
  0x46   :  { %908 = vmatprep.subr.bf16.mxu1 %v1099_v40 }
  0x47   :  { %512 = vmatmul.mubr.bf16.vlgmr.msra.gmra.mxu0 %v766_v34 }
  0x48   :  { %552 = vmatmul.mubr.bf16.vlgmr.msra.gmra.mxu1 %v768_v36  ;;  %876 = vmatpush3.bf16.msra.mxu0 %v979_v39 }
  0x49   :  { %910 = vmatprep.mubr.msk.bf16.mxu1 %vm1100_vm0, %v1099_v40  ;;  %877 = vmatprep.subr.bf16.mxu0 %v980_v41 }
  0x4a   :  { %909 = vmatpush3.bf16.msra.mxu1 %v994_v50  ;;  %591 = vmatprep.mubr.bf16.mxu0 %v771_v52 }
  0x4b   :  { %914 = vmatprep.subr.bf16.mxu1 %v1099_v40 }
  0x4c   :  { %878 = vmatpush3.bf16.msra.mxu0 %v981_v42 }
  0x4d   :  { %879 = vmatprep.subr.bf16.mxu0 %v982_v43 }
  0x50   :  { %880 = vmatpush3.bf16.msra.mxu0 %v983_v44  ;;  %911 = vmatmul.mubr.msk.bf16.vlgmr.msra.gmra.mxu1 %vm475_vm1, %v997_v53 }
  0x51   :  { %881 = vmatprep.subr.bf16.mxu0 %v984_v45  ;;  %930 = vmatprep.mubr.msk.bf16.mxu1 %vm1100_vm0, %v1099_v40 }
  0x52   :  { %915 = vmatpush3.bf16.msra.mxu1 %v998_v60 }
  0x53   :  { %916 = vmatprep.subr.bf16.mxu1 %v1099_v40 }
  0x54   :  { %882 = vmatpush3.bf16.msra.mxu0 %v985_v46 }
  0x55   :  { %883 = vmatprep.subr.bf16.mxu0 %v986_v47 }
  0x56   :  { %917 = vmatpush3.bf16.msra.mxu1 %v999_v61 }
  0x57   :  { %918 = vmatprep.subr.bf16.mxu1 %v1099_v40 }
  0x58   :  { %884 = vmatpush3.bf16.msra.mxu0 %v987_v48 }
  0x59   :  { %885 = vmatprep.subr.bf16.mxu0 %v988_v49 }
  0x5a   :  { %919 = vmatpush3.bf16.msra.mxu1 %v1000_v62 }
  0x5b   :  { %920 = vmatprep.subr.bf16.mxu1 %v1099_v40 }
  0x5c   :  { %886 = vmatpush3.bf16.msra.mxu0 %v989_v54 }
  0x5d   :  { %887 = vmatprep.subr.bf16.mxu0 %v990_v55 }
  0x5e   :  { %921 = vmatpush3.bf16.msra.mxu1 %v1001_v63 }
  0x5f   :  { %922 = vmatprep.subr.bf16.mxu1 %v1099_v40 }
  0x60   :  { %888 = vmatpush3.bf16.msra.mxu0 %v991_v56 }
  0x61   :  { %889 = vmatprep.subr.bf16.mxu0 %v992_v57 }
  0x62   :  { %923 = vmatpush3.bf16.msra.mxu1 %v1002_v0 }
  0x63   :  { %924 = vmatprep.subr.bf16.mxu1 %v1099_v40 }
  0x64   :  { %890 = vmatpush3.bf16.msra.mxu0 %v993_v58 }
  0x66   :  { %925 = vmatpush3.bf16.msra.mxu1 %v1003_v1 }
  0x67   :  { %592 = vmatmul.mubr.bf16.vlgmr.msra.gmra.mxu0 %v770_v59  ;;  %926 = vmatprep.subr.bf16.mxu1 %v1099_v40 }
  0x6a   :  { %927 = vmatpush3.bf16.msra.mxu1 %v1004_v2 }
  0x6b   :  { %928 = vmatprep.subr.bf16.mxu1 %v1099_v40 }
  0x6e   :  { %929 = vmatpush3.bf16.msra.mxu1 %v1005_v3 }
 0x107   :  { %v847_v4 = vpop.f32.mrf.mxu0 }
 0x108   :  { %v869_v5 = vpop.f32.mrf.mxu1 }
 0x109   :  { %v848_v6 = vpop.f32.mrf.mxu0 }
 0x10a   :  { %v870_v7 = vpop.f32.mrf.mxu1  ;;  %v849_v16 = vadd.f32 %v848_v6, %v847_v4 }
 0x10b   :  { %v850_v8 = vpop.f32.mrf.mxu0  ;;  %v871_v17 = vadd.f32 %v870_v7, %v869_v5 }
 0x10c   :  { %v872_v9 = vpop.f32.mrf.mxu1 }
 0x10d   :  { %v851_v10 = vpop.f32.mrf.mxu0  ;;  %v554_v20 = vadd.f32 %v871_v17, %v849_v16 }
 0x10e   :  { %v873_v11 = vpop.f32.mrf.mxu1 }
 0x110   :  { %v633_v12 = vpop.f32.mrf.mxu1 }
 0x112   :  { %v912_v13 = vpop.f32.mrf.mxu1 }
 0x114   :  { %v636_v14 = vpop.f32.mrf.mxu1 }
 0x116   :  { %v913_v15 = vpop.f32.mrf.mxu1 }
 0x127   :  { %v891_v18 = vpop.f32.mrf.mxu0 }
 0x129   :  { %v892_v19 = vpop.f32.mrf.mxu0 }
 0x12a   :  { %v893_v21 = vadd.f32 %v892_v19, %v891_v18 }
 0x12b   :  { %v894_v22 = vpop.f32.mrf.mxu0 }
 0x12c   :  { %v594_v23 = vadd.f32 %v893_v21, %v554_v20 }
 0x12d   :  { %v895_v24 = vpop.f32.mrf.mxu0 }
 0x12e   :  { %v634_v25 = vadd.f32 %v633_v12, %v594_v23 }
 0x130   :  { %v639_v26 = vmax.f32 %v634_v25, 0.0 }
 0x132   :  { %v640_v27 = vpack.c.bf16 %v639_v26, %v639_v26 }
 0x134   :  { %931 = vmatmul.mubr.bf16.vlgmr.msra.gmra.mxu1 %v640_v27 }
 0x1f4   :  { %v739_v28 = vpop.f32.mrf.mxu1 }
 0x1f5   :  { %v745_v29 = vmul.f32 0.5, %v739_v28 }
 0x1f6   :  { %v932_v30 = vpop.f32.mrf.mxu1 }
 0x1f7   :  { %1006 = vtanh.f32 %v745_v29 }
 0x1f8   :  { %v742_v31 = vpop.f32.mrf.mxu1 }
 0x1fa   :  { %v933_v32 = vpop.f32.mrf.mxu1 }
 0x204   :  { %v1007_v33 = vpop.eup %1006 }
 0x205   :  { %v747_v34 = vmul.f32 0.5, %v1007_v33 }
 0x207   :  { %v748_v35 = vadd.f32 0.5, %v747_v34 }
 0x209   :  { %749 = vst [vmem:[#allocation8] sm:$0xff] %v748_v35 }
 0x20a   :  { %1079 = shalt.err (!%p1076_p5)
}
 0x20b   :  { %759 = dma.vmem_to_hbm [thread:$0]  %s757_s2, 128, %s1150_s3, [#allocation4]  }
 0x20c   :  { %1092 = dma.done.wait [#allocation4], 128  }
 0x20d   :  { %1093 = vsyncadd [#allocation4], 4294967168 }
 0x20e   :  { %763 = vsyncpa [#allocation3], 1 }
 0x20f   :  { %764 = vsyncpa [#allocation6], 1 }
 0x210   :  { %765 = vsyncpa [#allocation4], 1 }

</bundles_post_ra>
